<compile_context>
chip_gen: v7x
topology: tpu7x:2x2x1
jax: 0.10.0
libtpu: 0.0.40
codegen_flags: <defaults>
</compile_context>

<pallas_src>
import jax
import jax.numpy as jnp
from jax.experimental import pallas as pl
from jax.experimental.pallas import tpu as pltpu


def _round_up(x, m):
    return ((x + m - 1) // m) * m


def _physical_vmem_bytes():
    """Per-TensorCore VMEM capacity (v5e/v6e: 128 MiB, v7x: 64 MiB)."""
    try:
        return int(pltpu.get_tpu_info().vmem_capacity_bytes)
    except Exception:  # older jax / host-only tracing: assume the smallest (v7x).
        return 64 << 20


def _vmem_bytes_estimate(t_tile, hidden_size, src_len, src_len_pad,
                         in_itemsize, out_itemsize):
    """Per-grid-step VMEM: 2x-buffered pipeline blocks + in-kernel f32 temporaries.

    (Fixes the earlier formula, which double-counted buffering and ignored the
    f32 intermediates.)
    """
    dbl = 2  # Pallas double-buffers every BlockSpec operand, incl. constant-index ones.
    blocks = dbl * (t_tile * hidden_size * in_itemsize          # h_t tile
                    + src_len * hidden_size * in_itemsize       # h_s slab (per batch)
                    + hidden_size * hidden_size * in_itemsize   # W
                    + t_tile * src_len_pad * out_itemsize)      # output tile
    temps = 4 * (t_tile * hidden_size                           # proj (f32)
                 + 2 * t_tile * src_len                         # scores + exp (f32)
                 + t_tile * src_len_pad)                        # lane-padded attn (f32)
    return blocks + temps


def _pick_t_tile(tgt_len, batch, hidden_size, src_len, src_len_pad,
                 in_itemsize, out_itemsize, budget_bytes):
    """Largest MXU/lane-friendly t-tile (multiple of 8) that fits the VMEM budget."""
    if tgt_len <= 8:
        return tgt_len
    cands = {c for c in (512, 384, 256, 128, 64, 32, 16, 8) if c <= tgt_len}
    if tgt_len <= 512:
        cands.add(tgt_len)  # a single t tile equals the full dim -> always a legal block
    t_tile = 8
    for c in sorted(cands, reverse=True):
        if _vmem_bytes_estimate(c, hidden_size, src_len, src_len_pad,
                                in_itemsize, out_itemsize) <= budget_bytes:
            t_tile = c
            break
    if batch == 1:
        # v7x has 2 TensorCores sharded over "parallel" grid axes; guarantee >= 2 tiles
        # along t so the second core is not idle when batch is 1.
        t_tile = min(t_tile, max(8, (((tgt_len + 1) // 2) // 8) * 8))
    return t_tile


def attn_general_kernel(ht_ref, hs_ref, w_ref, out_ref):
    """One (batch, t-tile) grid step.

    ht_ref : (tT, H)      target hidden rows (already in the torch .view layout)
    hs_ref : (S, H)       encoder outputs for this batch element
    w_ref  : (H, H)       nn.Linear weight, (out_features, in_features)
    out_ref: (tT, S_pad)  softmax attention weights, last dim lane-padded
    """
    ht = ht_ref[...]
    hs = hs_ref[...]
    w = w_ref[...]

    # proj = ht @ W^T : contract ht's H with W's in-features dim (dim 1); the MXU
    # performs the transposed contraction natively (no host/kernel W.T copy).
    proj = jax.lax.dot_general(
        ht, w, dimension_numbers=(((1,), (1,)), ((), ())),
        preferred_element_type=jnp.float32)                        # (tT, H) f32

    # For low-precision inputs keep the scores matmul at the narrow dtype instead of
    # up-casting the (S, H) slab.  (f32 inputs stay f32, which is what the 1e-5
    # tolerance test below uses; bf16 deployments trade a little accuracy here.)
    if proj.dtype != hs.dtype:
        proj = proj.astype(hs.dtype)

    # scores = proj @ hs^T, again a dot_general contracting on H so no explicit
    # transpose / XLU copy is materialized.
    scores = jax.lax.dot_general(
        proj, hs, dimension_numbers=(((1,), (1,)), ((), ())),
        preferred_element_type=jnp.float32)                        # (tT, S) f32

    # Numerically stable row softmax over the source dimension (f32 throughout).
    m = jnp.max(scores, axis=-1, keepdims=True)
    e = jnp.exp(scores - m)
    denom = jnp.sum(e, axis=-1, keepdims=True)
    # EUP reciprocal (approx) + one Newton-Raphson step -> divide becomes a multiply.
    inv = pl.reciprocal(denom, approx=True)
    inv = inv * (2.0 - denom * inv)
    attn = e * inv                                                 # (tT, S)

    # Lane-dense store: the output block's last dim is padded to a multiple of 128;
    # fill the padded columns with zeros (the wrapper slices them away).  Rows beyond
    # tgt_len in a ragged edge t-tile carry garbage softmax values, which is harmless:
    # rows are independent and their writeback is masked off by Pallas.
    t_rows, s = attn.shape
    s_pad = out_ref.shape[-1]
    if s_pad != s:
        attn = jnp.concatenate(
            [attn, jnp.zeros((t_rows, s_pad - s), dtype=attn.dtype)], axis=-1)
    out_ref[...] = attn.astype(out_ref.dtype)


def attn_forward(hidden, encoder_outputs, W, *, t_tile=None):
    """Forward pass of Attn(method='general').

    hidden:          (tgt_len, tgt_batch, H)
    encoder_outputs: (src_len, src_batch, H)
    W:               (H, H) nn.Linear weight (out_features, in_features), no bias.
    Returns:         (batch, tgt_len, src_len) softmax attention weights.
    """
    tgt_len, tgt_batch, hidden_size = hidden.shape
    src_len, src_batch, hidden_size2 = encoder_outputs.shape
    assert hidden_size == hidden_size2 and tgt_batch == src_batch

    in_itemsize = jnp.dtype(hidden.dtype).itemsize
    out_dtype = hidden.dtype
    out_itemsize = jnp.dtype(out_dtype).itemsize

    # Reproduce torch's .view exactly: a row-major reinterpretation of the
    # (tgt_len, tgt_batch) leading dims as (tgt_batch, tgt_len) -- NOT a transpose.
    # Both reshapes are layout-preserving (no HBM round trip).
    h_t = hidden.reshape(tgt_batch * tgt_len, hidden_size)
    h_t = h_t.reshape(tgt_batch, tgt_len, hidden_size)

    # torch: encoder_output.transpose(0, 1) -> (batch, src_len, H).
    # A BlockSpec batch-pick on the untransposed (S, B, H) layout would need a
    # (S, 1, H) block (second-minor block dim 1), which violates the (8,128)/full-dim
    # block rule for batch > 1, so we keep one host-side transpose.
    # TODO(synk): replace with an in-kernel make_async_copy(enc.at[:, b, :], hs_vmem)
    # gather (memory_space=pl.ANY) if this transpose shows up in profiles.
    h_s = jnp.transpose(encoder_outputs, (1, 0, 2))

    # Lane-dense output stores + no masked vst: pad the output's last dim up to a
    # multiple of 128 (no-op when src_len is already lane-aligned).
    src_len_pad = _round_up(src_len, 128)

    phys_vmem = _physical_vmem_bytes()
    budget = max(16 << 20, int(phys_vmem * 0.45))  # headroom for Mosaic scratch etc.

    if t_tile is None:
        tT = _pick_t_tile(tgt_len, tgt_batch, hidden_size, src_len, src_len_pad,
                          in_itemsize, out_itemsize, budget)
    else:
        tT = max(1, min(int(t_tile), tgt_len))
        if tT < tgt_len and tT % 8 != 0:
            tT = min(max(8, (tT // 8) * 8), tgt_len)

    # Batch OUTER, t INNER: h_s / W have constant block indices across the inner axis,
    # so they are only re-fetched at batch boundaries.  Do not flip this order.
    grid = (tgt_batch, pl.cdiv(tgt_len, tT))

    vmem_need = _vmem_bytes_estimate(tT, hidden_size, src_len, src_len_pad,
                                     in_itemsize, out_itemsize)
    vmem_limit = int(min(max(vmem_need + (4 << 20), 16 << 20),
                         int(phys_vmem * 0.75)))

    cost = pl.CostEstimate(
        flops=int(2 * tgt_batch * tgt_len * hidden_size * hidden_size
                  + 2 * tgt_batch * tgt_len * src_len * hidden_size),
        transcendentals=int(tgt_batch * tgt_len * src_len),
        bytes_accessed=int((h_t.size + h_s.size + W.size) * in_itemsize
                           + tgt_batch * tgt_len * src_len_pad * out_itemsize),
    )

    out_padded = pl.pallas_call(
        attn_general_kernel,
        out_shape=jax.ShapeDtypeStruct((tgt_batch, tgt_len, src_len_pad), out_dtype),
        grid_spec=pltpu.PrefetchScalarGridSpec(
            num_scalar_prefetch=0,
            grid=grid,
            in_specs=[
                # h_t tile for this (batch, t-tile) step.
                pl.BlockSpec((pl.Squeezed(), tT, hidden_size),
                             lambda b, t: (b, t, 0)),
                # Full encoder slab for this batch element (constant across t).
                pl.BlockSpec((pl.Squeezed(), src_len, hidden_size),
                             lambda b, t: (b, 0, 0)),
                # Linear weight, fed untransposed (constant across the whole grid).
                # NOTE: pipeline_mode=pl.Buffered(1) (single-buffering the constant
                # W / h_s slabs) is skipped for lowering portability; their doubled
                # buffers are charged to the VMEM budget above instead.
                pl.BlockSpec((hidden_size, hidden_size), lambda b, t: (0, 0)),
            ],
            out_specs=pl.BlockSpec((pl.Squeezed(), tT, src_len_pad),
                                   lambda b, t: (b, t, 0)),
        ),
        compiler_params=pltpu.CompilerParams(
            dimension_semantics=("parallel", "parallel"),
            vmem_limit_bytes=vmem_limit,
        ),
        cost_estimate=cost,
    )(h_t, h_s, W)

    # TODO(synk): for very long encoder sequences, add an S grid axis with a
    # flash-style online softmax so VMEM use stops scaling with src_len.
    if src_len_pad != src_len:
        return out_padded[:, :, :src_len]
    return out_padded


def attn_reference(hidden, encoder_outputs, W):
    """Pure-JAX reference mirroring the PyTorch module line by line."""
    tgt_len, tgt_batch, hidden_size = hidden.shape
    h_t_ = hidden.reshape(tgt_batch * tgt_len, hidden_size)
    h_t_ = h_t_ @ W.T
    h_t = h_t_.reshape(tgt_batch, tgt_len, hidden_size)
    h_s = jnp.transpose(encoder_outputs, (1, 0, 2))
    align = jnp.einsum("btd,bsd->bts", h_t, h_s)
    return jax.nn.softmax(align, axis=-1)


if __name__ == "__main__":
    key = jax.random.PRNGKey(0)
    k1, k2, k3 = jax.random.split(key, 3)

    hidden_size = 32
    tgt_len, src_len, batch = 8, 8, 2

    # Deterministic synthetic Linear weight, shape (out_features, in_features) = (H, H).
    W = jax.random.normal(k3, (hidden_size, hidden_size), dtype=jnp.float32) * 0.1

    hidden = jax.random.normal(k1, (tgt_len, batch, hidden_size), dtype=jnp.float32)
    encoder_outputs = jax.random.normal(k2, (src_len, batch, hidden_size),
                                        dtype=jnp.float32)

    out = attn_forward(hidden, encoder_outputs, W)
    out = jax.block_until_ready(out)

    ref = attn_reference(hidden, encoder_outputs, W)
    assert out.shape == (batch, tgt_len, src_len)
    assert jnp.allclose(out, ref, atol=1e-5, rtol=1e-5)
    # softmax rows sum to 1
    assert jnp.allclose(jnp.sum(out, axis=-1), jnp.ones((batch, tgt_len)), atol=1e-5)

    print("KERNEL_OK")
</pallas_src>

<mosaic_0001>
module attributes {stable_mosaic.version = 11 : i64} {
  func.func @attn_general_kernel(%arg0: i32, %arg1: i32, %arg2: memref<1x8x32xf32, #tpu.memory_space<vmem>>, %arg3: memref<1x8x32xf32, #tpu.memory_space<vmem>>, %arg4: memref<32x32xf32, #tpu.memory_space<vmem>>, %arg5: memref<1x8x128xf32, #tpu.memory_space<vmem>>) attributes {dimension_semantics = [#tpu.dimension_semantics<parallel>, #tpu.dimension_semantics<parallel>], iteration_bounds = array<i64: 2, 1>, scalar_prefetch = 0 : i64, scratch_operands = 0 : i64, tpu.core_type = #tpu.core_type<tc>, window_params = [{transform_indices = @transform_0, window_bounds = array<i64: 1, 8, 32>}, {transform_indices = @transform_1, window_bounds = array<i64: 1, 8, 32>}, {pipeline_mode = #tpu.pipeline_mode<synchronous>, transform_indices = @transform_2, window_bounds = array<i64: 32, 32>}, {transform_indices = @transform_3, window_bounds = array<i64: 1, 8, 128>}]} {
    %c0 = arith.constant 0 : index
    %c0_0 = arith.constant 0 : index
    %c0_1 = arith.constant 0 : index
    %0 = vector.load %arg2[%c0, %c0_0, %c0_1] : memref<1x8x32xf32, #tpu.memory_space<vmem>>, vector<1x8x32xf32>
    %1 = vector.shape_cast %0 : vector<1x8x32xf32> to vector<8x32xf32>
    %c0_2 = arith.constant 0 : index
    %c0_3 = arith.constant 0 : index
    %c0_4 = arith.constant 0 : index
    %2 = vector.load %arg3[%c0_2, %c0_3, %c0_4] : memref<1x8x32xf32, #tpu.memory_space<vmem>>, vector<1x8x32xf32>
    %3 = vector.shape_cast %2 : vector<1x8x32xf32> to vector<8x32xf32>
    %c0_5 = arith.constant 0 : index
    %c0_6 = arith.constant 0 : index
    %4 = vector.load %arg4[%c0_5, %c0_6] : memref<32x32xf32, #tpu.memory_space<vmem>>, vector<32x32xf32>
    %cst = arith.constant dense<0.000000e+00> : vector<8x32xf32>
    %5 = tpu.matmul %1, %4, %cst {dimension_numbers = #tpu.dot_dimension_numbers<[1], [1], [0], [0], [0, 0, 1, 0], [], []>} : vector<8x32xf32>, vector<32x32xf32>, vector<8x32xf32> -> vector<8x32xf32>
    %cst_7 = arith.constant dense<0.000000e+00> : vector<8x8xf32>
    %6 = tpu.matmul %5, %3, %cst_7 {dimension_numbers = #tpu.dot_dimension_numbers<[1], [1], [0], [0], [0, 0, 1, 0], [], []>} : vector<8x32xf32>, vector<8x32xf32>, vector<8x8xf32> -> vector<8x8xf32>
    %cst_8 = arith.constant dense<0xFF800000> : vector<8xf32>
    %7 = vector.multi_reduction <maximumf>, %6, %cst_8 [1] : vector<8x8xf32> to vector<8xf32>
    %8 = vector.shape_cast %7 : vector<8xf32> to vector<8x1xf32>
    %9 = vector.broadcast %8 : vector<8x1xf32> to vector<8x8xf32>
    %10 = arith.subf %6, %9 : vector<8x8xf32>
    %11 = math.exp %10 : vector<8x8xf32>
    %cst_9 = arith.constant dense<0.000000e+00> : vector<8xf32>
    %12 = vector.multi_reduction <add>, %11, %cst_9 [1] : vector<8x8xf32> to vector<8xf32>
    %13 = vector.shape_cast %12 : vector<8xf32> to vector<8x1xf32>
    %14 = tpu.reciprocal %13 {approx = true} : vector<8x1xf32> -> vector<8x1xf32>
    %15 = arith.mulf %13, %14 : vector<8x1xf32>
    %cst_10 = arith.constant 2.000000e+00 : f32
    %16 = vector.broadcast %cst_10 : f32 to vector<8x1xf32>
    %17 = arith.subf %16, %15 : vector<8x1xf32>
    %18 = arith.mulf %14, %17 : vector<8x1xf32>
    %19 = vector.broadcast %18 : vector<8x1xf32> to vector<8x8xf32>
    %20 = arith.mulf %11, %19 : vector<8x8xf32>
    %cst_11 = arith.constant 0.000000e+00 : f32
    %21 = vector.broadcast %cst_11 : f32 to vector<8x120xf32>
    %22 = tpu.concatenate %20, %21 in 1 : vector<8x8xf32>, vector<8x120xf32> -> vector<8x128xf32>
    %c0_12 = arith.constant 0 : index
    %c0_13 = arith.constant 0 : index
    %c0_14 = arith.constant 0 : index
    %23 = vector.load %arg5[%c0_12, %c0_13, %c0_14] : memref<1x8x128xf32, #tpu.memory_space<vmem>>, vector<1x8x128xf32>
    %24 = vector.shape_cast %23 : vector<1x8x128xf32> to vector<8x128xf32>
    %25 = vector.shape_cast %22 : vector<8x128xf32> to vector<1x8x128xf32>
    tpu.vector_store %arg5[%c0_12, %c0_13, %c0_14], %25 {strides = array<i32>} : memref<1x8x128xf32, #tpu.memory_space<vmem>>, vector<1x8x128xf32>,
    return
  }
  func.func @transform_0(%arg0: i32, %arg1: i32) -> (i32, i32, i32) {
    %c0_i32 = arith.constant 0 : i32
    %c0_i32_0 = arith.constant 0 : i32
    return %arg0, %arg1, %c0_i32 : i32, i32, i32
  }
  func.func @transform_1(%arg0: i32, %arg1: i32) -> (i32, i32, i32) {
    %c0_i32 = arith.constant 0 : i32
    %c0_i32_0 = arith.constant 0 : i32
    %c0_i32_1 = arith.constant 0 : i32
    return %arg0, %c0_i32, %c0_i32_0 : i32, i32, i32
  }
  func.func @transform_2(%arg0: i32, %arg1: i32) -> (i32, i32) {
    %c0_i32 = arith.constant 0 : i32
    %c0_i32_0 = arith.constant 0 : i32
    %c0_i32_1 = arith.constant 0 : i32
    return %c0_i32, %c0_i32_0 : i32, i32
  }
  func.func @transform_3(%arg0: i32, %arg1: i32) -> (i32, i32, i32) {
    %c0_i32 = arith.constant 0 : i32
    %c0_i32_0 = arith.constant 0 : i32
    return %arg0, %arg1, %c0_i32 : i32, i32, i32
  }
}

</mosaic_0001>

<bundles_post_ra>
// kernel: tpu_custom_call.1
= control target key start
LH: loop header
LB: loop body
LE: loop exit
PB: predicated region body
PF: predicated region fallthrough
CT: control target
= control target key end

     0   :  { %s1177_s0 = inlined_call_operand.hbm [shape: f32[2,8,32], index: 0, kind: input, shape index: {}]   ;;  %s1178_s1 = inlined_call_operand.hbm [shape: f32[2,8,32], index: 1, kind: input, shape index: {}]   ;;  %s1179_s2 = inlined_call_operand.hbm [shape: f32[32,32], index: 2, kind: input, shape index: {}]   ;;  %s1180_s3 = inlined_call_operand.hbm [shape: f32[2,8,128], index: 3, kind: output, shape index: {}]  }
   0x1   :  { %1186 = sst [smem:[#allocation14_spill]] %s1179_s2 }
   0x2   :  { %8 = vsyncpa [#allocation3], 0 }
   0x3   :  { %10 = vsyncpa [#allocation3 + $0x1], 0 }
   0x4   :  { %11 = vsyncpa [#allocation6], 0 }
   0x5   :  { %13 = vsyncpa [#allocation6 + $0x1], 0 }
   0x6   :  { %14 = vsyncpa [#allocation4], 0 }
   0x7   :  { %16 = vsyncpa [#allocation4 + $0x1], 0  ;;  %s918_s12 = smov 0   ;;  %s920_s13 = smov 0  }
   0x8   :  { %s922_s14 = smov 0   ;;  %s924_s15 = smov 0  }
   0x9   :  { %s926_s16 = smov 0   ;;  %s928_s17 = smov 0  }
   0xa LB: > { %s949_s18 = sadd.s32 4294967295, %s887_s17   ;;  %s567_s19 = sadd.s32 4294967294, %s887_s17   ;;  %s887_s17 = sphi %s928_s17, %s22_s17   ;;  %s883_s16 = sphi %s926_s16, %s1209_s16   ;;  %s879_s15 = sphi %s924_s15, %s1208_s15   ;;  %s875_s14 = sphi %s922_s14, %s1207_s14   ;;  %s871_s13 = sphi %s920_s13, %s1206_s13   ;;  %s867_s12 = sphi %s918_s12, %s1205_s12  }
   0xb   : > { %p56_p0 = scmp.ne.s32.totalorder %s871_s13, %s867_s12  ;;  %p1181_p1 = scmp.eq.s32.totalorder %s949_s18, 0 }
   0xc   : > { %p135_p3 = scmp.eq.s32.totalorder %s567_s19, 1  ;;  %p568_p5 = scmp.ge.s32.totalorder %s887_s17, 1 }
   0xd   : > { %p958_p4 = por %p1181_p1, %p56_p0  ;;  %p142_p7 = scmp.lt.s32.totalorder %s887_s17, 3 }
   0xe   : > { %p963_p6 = por %p135_p3, %p56_p0  ;;  %s889_s23 = smov [#allocation7]  }
   0xf   : > { %s1187_s20 = scalar_select %p958_p4, 1, 0 }
  0x10   : > { %s1188_s21 = scalar_select %p963_p6, 1, 0 }
  0x11   : > { %p968_p8 = pnand %p568_p5, %p142_p7  ;;  %s154_s24 = sshll.u32 %s889_s23, 4  ;;  %s155_s24 = int_to_ptr.vmem [resolvable:$true] %s154_s24 }
  0x12   : > { %s34_s26 = sadd.s32 1, %s883_s16  ;;  %s1191_s2 = sld [smem:[#allocation14_spill]] }
  0x13   : > { %s1189_s22 = scalar_select %p968_p8, 1, 0 }
  0x14   : > { %p632_p9 = pneg %p968_p8 }
  0x16   : > { %p977_p11 = pnand %p632_p9, %p1181_p1 }
  0x18   : > { %s709_s29 = scalar_lea.hbm %s1191_s2, 512  ;;  %p711_p13 = pneg %p977_p11 }
  0x19   : > { %p710_p12 = scmp.ne.s32.totalorder %s1191_s2, %s709_s29  ;;  %p716_p5 = scmp.lt.u32.totalorder %s709_s29, %s1191_s2 }
  0x1b   : > { %p712_p0 = pnand %p711_p13, %p710_p12 }
  0x1d   : > { %p713_p3 = pneg %p712_p0 }
  0x1f   : > { %p718_p7 = pnand %p716_p5, %p713_p3 }
  0x21   : > { %721 = shalt.err (!%p718_p7)
}
  0x22   : > { %s722_s7 = scalar_lea.vmem %s155_s24, 512  ;;  %p730_p2 = scmp.lt.s32.totalorder %s155_s24, %s155_s24 }
  0x23   : > { %p723_p9 = scmp.ne.s32.totalorder %s155_s24, %s722_s7  ;;  %p731_p6 = scmp.lt.s32.totalorder %s722_s7, %s722_s7 }
  0x25   : > { %p725_p10 = pnand %p723_p9, %p711_p13  ;;  %p732_p4 = por %p731_p6, %p730_p2 }
  0x27   : > { %p726_p1 = pneg %p725_p10 }
  0x29   : > { %p733_p8 = pnand %p732_p4, %p726_p1 }
  0x2b   : > { %736 = shalt.err (!%p733_p8)
}
  0x2c   : > { %s890_s8 = smov 128   ;;  %s891_s9 = smov 8  }
  0x2d   : > { %635 = dma.hbm_to_vmem [thread:$0]  (!%p977_p11), %s1191_s2, 512, %s155_s24, [#allocation6], %s890_s8, %s890_s8, %s891_s9  }
  0x2e   : > { %p36_p1 = scmp.ge.s32.totalorder %s34_s26, 2  ;;  %s43_s19 = sadd.s32 1, %s875_s14 }
  0x2f   : > { %p50_p2 = scmp.ne.s32.totalorder %s875_s14, %s871_s13  ;;  %p51_p4 = scmp.eq.s32.totalorder %s887_s17, 0 }
  0x30   : > { %s1211_s26 = smov (%p36_p1, %s34_s26), 0  ;;  %p1194_p8 = scmp.eq.s32.totalorder %s949_s18, 1 }
  0x31   : > { %1192 = sst [smem:[#allocation13_spill]] %s1211_s26  ;;  %p1004_p6 = por %p51_p4, %p50_p2 }
  0x32   : > { %p1010_p10 = por %p1194_p8, %p50_p2  ;;  %s38_s27 = ssub.s32 %s883_s16, %s1211_s26 }
  0x33   : > { %p648_p11 = scmp.lt.s32.totalorder %s887_s17, 2  ;;  %p41_p12 = scmp.eq.s32.totalorder %s38_s27, 0 }
  0x34   : > { %s1195_s25 = scalar_select %p1010_p10, 1, 0 }
  0x35   : > { %s168_s24 = sand.u32 1, %s875_s14   ;;  %s572_s30 = sshll.u32 %s883_s16, 7 }
  0x36   : > { %s1018_s28 = sshll.u32 %s168_s24, 3  ;;  %s1027_s6 = scalar_lea.hbm %s1177_s0, %s572_s30 }
  0x37   : > { %s1021_s29 = scalar_select %p41_p12, %s875_s14, %s43_s19  }
  0x38   : > { %s172_s7 = scalar_lea.vmem [#allocation2], %s1018_s28  ;;  %p1034_p13 = pnand %p648_p11, %p1004_p6 }
  0x39   : > { %s180_s8 = sshll.u32 %s172_s7, 4  ;;  %s1041_s19 = scalar_lea.hbm %s1178_s1, %s572_s30  ;;  %s1030_s8 = int_to_ptr.vmem [resolvable:$true] %s180_s8 }
  0x3a   : > { %s187_s27 = sand.u32 1, %s887_s17   ;;  %s169_s4 = scalar_lea.sflag [#allocation3], %s168_s24 }
  0x3b   : > { %s737_s5 = scalar_lea.hbm %s1027_s6, 128  ;;  %p739_p3 = pneg %p1034_p13 }
  0x3c   : > { %p738_p0 = scmp.ne.s32.totalorder %s1027_s6, %s737_s5  ;;  %s742_s2 = scalar_lea.hbm %s1177_s0, 256 }
  0x3d   : > { %p743_p9 = scmp.lt.u32.totalorder %s1027_s6, %s1177_s0  ;;  %p744_p1 = scmp.lt.u32.totalorder %s742_s2, %s737_s5 }
  0x3e   : > { %p740_p5 = pnand %p739_p3, %p738_p0  ;;  %p746_p4 = scmp.lt.u32.totalorder %s737_s5, %s1027_s6 }
  0x3f   : > { %p745_p2 = por %p744_p1, %p743_p9 }
  0x40   : > { %p741_p7 = pneg %p740_p5 }
  0x41   : > { %p747_p6 = por %p746_p4, %p745_p2 }
  0x43   : > { %p748_p8 = pnand %p747_p6, %p741_p7 }
  0x45   : > { %751 = shalt.err (!%p748_p8)
}
  0x46   : > { %s752_s24 = scalar_lea.vmem %s1030_s8, 128  ;;  %s892_s30 = smov [#allocation2]  }
  0x47   : > { %p753_p11 = scmp.ne.s32.totalorder %s1030_s8, %s752_s24  ;;  %s757_s11 = sshll.u32 %s892_s30, 4  ;;  %s758_s11 = int_to_ptr.vmem [resolvable:$false] %s757_s11 }
  0x48   : > { %s759_s26 = scalar_lea.vmem %s758_s11, 256  ;;  %p760_p5 = scmp.lt.s32.totalorder %s1030_s8, %s758_s11 }
  0x49   : > { %p755_p12 = pnand %p753_p11, %p739_p3  ;;  %p761_p9 = scmp.lt.s32.totalorder %s759_s26, %s752_s24 }
  0x4b   : > { %p756_p0 = pneg %p755_p12  ;;  %p762_p1 = por %p761_p9, %p760_p5 }
  0x4d   : > { %p763_p2 = pnand %p762_p1, %p756_p0 }
  0x4f   : > { %766 = shalt.err (!%p763_p2)
}
  0x50   : > { %639 = dma.hbm_to_vmem [thread:$0]  (!%p1034_p13), %s1027_s6, 128, %s1030_s8, %s169_s4  }
  0x51   : > { %s191_s2 = scalar_lea.vmem [#allocation5], %s1018_s28  ;;  %s188_s23 = scalar_lea.sflag [#allocation6], %s187_s27 }
  0x52   : > { %s198_s5 = sshll.u32 %s191_s2, 4  ;;  %s767_s7 = scalar_lea.hbm %s1041_s19, 128  ;;  %s199_s5 = int_to_ptr.vmem [resolvable:$true] %s198_s5 }
  0x53   : > { %p768_p7 = scmp.ne.s32.totalorder %s1041_s19, %s767_s7  ;;  %s772_s30 = scalar_lea.hbm %s1178_s1, 256 }
  0x54   : > { %p773_p8 = scmp.lt.u32.totalorder %s1041_s19, %s1178_s1  ;;  %p774_p11 = scmp.lt.u32.totalorder %s772_s30, %s767_s7 }
  0x55   : > { %p770_p4 = pnand %p768_p7, %p739_p3  ;;  %p776_p0 = scmp.lt.u32.totalorder %s767_s7, %s1041_s19 }
  0x56   : > { %p775_p12 = por %p774_p11, %p773_p8 }
  0x57   : > { %p771_p6 = pneg %p770_p4 }
  0x58   : > { %p777_p5 = por %p776_p0, %p775_p12 }
  0x5a   : > { %p778_p9 = pnand %p777_p5, %p771_p6 }
  0x5c   : > { %781 = shalt.err (!%p778_p9)
}
  0x5d   : > { %s782_s28 = scalar_lea.vmem %s199_s5, 128  ;;  %s893_s6 = smov [#allocation5]  }
  0x5e   : > { %p783_p1 = scmp.ne.s32.totalorder %s199_s5, %s782_s28  ;;  %s787_s8 = sshll.u32 %s893_s6, 4  ;;  %s788_s8 = int_to_ptr.vmem [resolvable:$false] %s787_s8 }
  0x5f   : > { %s789_s27 = scalar_lea.vmem %s788_s8, 256  ;;  %p790_p4 = scmp.lt.s32.totalorder %s199_s5, %s788_s8 }
  0x60   : > { %p785_p2 = pnand %p783_p1, %p739_p3  ;;  %p791_p10 = scmp.lt.s32.totalorder %s789_s27, %s782_s28 }
  0x62   : > { %p786_p7 = pneg %p785_p2  ;;  %p792_p8 = por %p791_p10, %p790_p4 }
  0x64   : > { %p793_p11 = pnand %p792_p8, %p786_p7 }
  0x66   : > { %796 = shalt.err (!%p793_p11)
}
  0x67   : > { %642 = dma.hbm_to_vmem [thread:$0]  (!%p1034_p13), %s1041_s19, 128, %s199_s5, %s188_s23  }
  0x68   : > { %p1197_p6 = scmp.ne.s32.totalorder %s1189_s22, 0 }
  0x69   : > { %s1094_s4 = sand.u32 (!%p1197_p6), 1, %s871_s13   ;;  %p1198_p10 = scmp.ne.s32.totalorder (!%p1197_p6), %s1187_s20, 0 }
  0x6a   : > { %207 = sbr.rel (%p1197_p6) target bundleno = 897 (0x381), region = 32  ;;  %s1097_s2 = sshll.u32 (!%p1197_p6), %s1094_s4, 3 }
  0x6b   : > { %s210_s7 = scalar_lea.sflag (!%p1197_p6), [#allocation3], %s1094_s4  ;;  %s213_s10 = scalar_lea.vmem (!%p1197_p6), [#allocation2], %s1097_s2 }
  0x71   : > { %850 = dma.done.wait (%p1198_p10), %s210_s7, 128  }
  0x72   : > { %852 = vsyncadd (%p1198_p10), %s210_s7, 4294967168  ;;  %s218_s22 = sand.u32 1, %s949_s18   ;;  %s222_s19 = scalar_lea.vmem [#allocation5], %s1097_s2 }
  0x73   : > { %s219_s9 = scalar_lea.sflag [#allocation6], %s218_s22 }
  0x74   : > { %854 = dma.done.wait (%p1198_p10), %s219_s9, 128  }
  0x75   : > { %856 = vsyncadd (%p1198_p10), %s219_s9, 4294967168  ;;  %p1199_p13 = scmp.eq.s32.totalorder %s949_s18, 0 }
  0x77   : > { %858 = dma.done.wait (%p1199_p13), [#allocation6], 512   ;;  %p1200_p3 = pmov %p1199_p13 }
  0x78   : > { %v894_v0 = vmov 0.0|0.0   ;;  %vm895_vm0 = vmmov 0   ;;  %v896_v1 = vmov 0.0   ;;  %vm260_vm1 = vcmask 261120   ;;  %v256_v2 = vld [vmem:[#allocation7] sm:$0xff]  ;;  %v257_v3 = vld [vmem:[#allocation7 + $0x8] sm:$0xff] }
  0x79   : > { %860 = vsyncadd (%p1200_p3), [#allocation6], 4294966784  ;;  %614 = vmatprep.subr.bf16.mxu0 %v894_v0  ;;  %606 = vmatprep.mubr.msk.f32.mxu0 %vm895_vm0, %v896_v1  ;;  %v615_v4 = vpack.c.bf16 %v257_v3, %v256_v2  ;;  %v255_v5 = vld [vmem:[%s222_s19] sm:$0xff]  ;;  %v254_v9 = vld [vmem:[%s213_s10] sm:$0xff]  ;;  %vm422_vm3 = vcmask 64512   ;;  %s588_s18 = sshll.u32 %s879_s15, 7 }
  0x7a   : > { %609 = vmatprep.subr.mxu1 %v896_v1  ;;  %611 = vmatprep.mubr.msk.f32.mxu1 %vm895_vm0, %v896_v1  ;;  %vm616_vm2 = vmpackc.low %vm260_vm1, %vm260_vm1  ;;  %v258_v6 = vld [vmem:[#allocation7 + $0x10] sm:$0xff]  ;;  %v259_v7 = vld [vmem:[#allocation7 + $0x18] sm:$0xff]  ;;  %s253_s20 = scalar_lea.vmem [#allocation8], %s1097_s2  ;;  %s1127_s30 = scalar_lea.hbm %s1180_s3, %s588_s18 }
  0x7b   : > { %610 = vmatpush3.xpose.msk.msra.mxu1 %vm260_vm1, %v255_v5  ;;  %617 = vmatpush3.bf16.xpose.msk.msra.mxu0 %vm616_vm2, %v615_v4  ;;  %v619_v8 = vpack.c.bf16 %v259_v7, %v258_v6  ;;  %s454_s5 = sshll.u32 %s253_s20, 4  ;;  %s440_s11 = scalar_lea.sflag [#allocation4], %s1094_s4  ;;  %s1129_s5 = int_to_ptr.vmem [resolvable:$true] %s454_s5 }
  0x7c   : > { %618 = vmatprep.subr.bf16.mxu0 %v894_v0  ;;  %s797_s26 = scalar_lea.vmem %s1129_s5, 128  ;;  %p1201_p0 = scmp.ne.s32.totalorder %s1195_s25, 0 }
  0x7d   : > { %p798_p12 = scmp.ne.s32.totalorder %s1129_s5, %s797_s26  ;;  %s897_s15 = smov [#allocation8]  }
  0x7e   : > { %s801_s28 = sshll.u32 %s897_s15, 4  ;;  %s802_s28 = int_to_ptr.vmem [resolvable:$false] %s801_s28 }
  0x7f   : > { %p799_p5 = pnand %p798_p12, %p1201_p0  ;;  %s803_s6 = scalar_lea.vmem %s802_s28, 256 }
  0x80   : > { %p804_p1 = scmp.lt.s32.totalorder %s1129_s5, %s802_s28  ;;  %p805_p2 = scmp.lt.s32.totalorder %s803_s6, %s797_s26 }
  0x81   : > { %p800_p9 = pneg %p799_p5 }
  0x82   : > { %p806_p7 = por %p805_p2, %p804_p1 }
  0x83   : > { %621 = vmatpush3.bf16.xpose.msk.msra.mxu0 %vm616_vm2, %v619_v8 }
  0x84   : > { %p807_p4 = pnand %p806_p7, %p800_p9 }
  0x8a   : > { %607 = vmatmul.mubr.msk.f32.vlgmr.msra.gmra.mrb[0].mxu0 %vm260_vm1, %v254_v9 }
 0x15d   : > { %v342_v10 = vpop.f32.mrb[0].mxu0 }
 0x15e   : > { %v608_v11 = vpop.f32.mrb[1].mxu0  ;;  %612 = vmatmul.mubr.msk.f32.vlgmr.msra.gmra.mrb[0].mxu1 %vm260_vm1, %v342_v10 }
 0x231   : > { %v418_v12 = vpop.f32.mrb[0].mxu1 }
 0x232   : > { %v613_v13 = vpop.f32.mrb[1].mxu1  ;;  %v423_v14 = vsel %vm422_vm3, %v418_v12, -inf }
 0x233   : > { %424 = vmax.xlane.f32.xlu0 %v423_v14 }
 0x2c0   : > { %v425_v15 = vpop.xlane.xlu0 %424 }
 0x2c1   : > { %v426_v16 = vsub.f32 %v418_v12, %v425_v15 }
 0x2c3   : > { %v427_v17 = vmul.f32 1.442695, %v426_v16 }
 0x2c5   : > { %705 = vpow2.f32 %v427_v17 }
 0x2cf   : > { %v706_v18 = vpop.eup %705 }
 0x2d0   : > { %v429_v19 = vsel %vm422_vm3, %v706_v18, 0.0 }
 0x2d1   : > { %430 = vadd.xlane.f32.xlu0 %v429_v19 }
 0x35e   : > { %v431_v20 = vpop.xlane.xlu0 %430 }
 0x35f   : > { %707 = vrcp.f32 %v431_v20 }
 0x369   : > { %v708_v21 = vpop.eup %707 }
 0x36a   : > { %v433_v22 = vmul.f32 %v708_v21, %v431_v20 }
 0x36c   : > { %v434_v23 = vsub.f32 2.0, %v433_v22 }
 0x36e   : > { %v435_v24 = vmul.f32 %v708_v21, %v434_v23 }
 0x370   : > { %v436_v25 = vmul.f32 %v706_v18, %v435_v24 }
 0x372   : > { %v437_v26 = vsel %vm422_vm3, %v436_v25, 0.0 }
 0x373   : > { %438 = vst [vmem:[%s253_s20] sm:$0xff] %v437_v26 }
 0x374   : > { %810 = shalt.err (!%p807_p4)
}
 0x375   : > { %s811_s8 = scalar_lea.hbm %s1127_s30, 128  ;;  %s815_s2 = scalar_lea.hbm %s1180_s3, 256 }
 0x376   : > { %p812_p8 = scmp.ne.s32.totalorder %s1127_s30, %s811_s8  ;;  %p816_p10 = scmp.lt.u32.totalorder %s1127_s30, %s1180_s3 }
 0x377   : > { %p817_p13 = scmp.lt.u32.totalorder %s815_s2, %s811_s8  ;;  %p819_p12 = scmp.lt.u32.totalorder %s811_s8, %s1127_s30 }
 0x378   : > { %p813_p11 = pnand %p812_p8, %p1201_p0 }
 0x379   : > { %p818_p3 = por %p817_p13, %p816_p10 }
 0x37a   : > { %p814_p6 = pneg %p813_p11 }
 0x37b   : > { %p820_p5 = por %p819_p12, %p818_p3 }
 0x37d   : > { %p821_p9 = pnand %p820_p5, %p814_p6 }
 0x37f   : > { %824 = shalt.err (!%p821_p9)
}
 0x380   : > { %630 = dma.vmem_to_hbm [thread:$0]  (%p1201_p0), %s1129_s5, 128, %s1127_s30, %s440_s11  }
 0x381 PF: > { %s466_s22 = sand.u32 1, %s867_s12   ;;  %p1202_p1 = scmp.ne.s32.totalorder %s1188_s21, 0 }
 0x382   : > { %p1203_p2 = scmp.ge.s32.totalorder %s887_s17, 2  ;;  %s467_s9 = scalar_lea.sflag [#allocation4], %s466_s22 }
 0x384   : > { %p644_p7 = pnand %p1203_p2, %p1202_p1 }
 0x386   : > { %862 = dma.done.wait (!%p644_p7), %s467_s9, 128  }
 0x387   : > { %864 = vsyncadd (!%p644_p7), %s467_s9, 4294967168  ;;  %s22_s17 = sadd.s32 1, %s887_s17   ;;  %s1204_s25 = sld [smem:[#allocation13_spill]] }
 0x388   : > { %p19_p4 = scmp.ge.s32.totalorder %s22_s17, 4   ;;  %s1205_s12 = smov %s871_s13 }
 0x389   : > { %s1206_s13 = smov %s875_s14  ;;  %s1207_s14 = smov %s1021_s29 }
 0x38a   : > { %s1208_s15 = smov %s883_s16  ;;  %21 = sbr.rel (!%p19_p4) target bundleno = 10 (0xa), region = 94 }
 0x38d   : > { %s1209_s16 = smov %s1204_s25 }
 0x391   :  { %472 = vsyncpa [#allocation3], 1 }
 0x392   :  { %474 = vsyncpa [#allocation3 + $0x1], 1 }
 0x393   :  { %475 = vsyncpa [#allocation6], 1 }
 0x394   :  { %477 = vsyncpa [#allocation6 + $0x1], 1 }
 0x395   :  { %478 = vsyncpa [#allocation4], 1 }
 0x396   :  { %480 = vsyncpa [#allocation4 + $0x1], 1 }

</bundles_post_ra>
